<compile_context>
chip_gen: v7x
topology: tpu7x:2x2x1
jax: 0.10.0
libtpu: 0.0.40
codegen_flags: <defaults>
</compile_context>

<pallas_src>
import jax
import jax.numpy as jnp
from jax.experimental import pallas as pl
from jax.experimental.pallas import tpu as pltpu


def _global_flow_loss_kernel(w_ref, x1_ref, x2_ref, out_ref):
    """One grid step: one batch element, one split, one lane-dense slab of TL pixels.

    w_ref  : (C, 4) f32 folded diff-head weights in SMEM,
             columns = [u|im1, v|im1, u|im2, v|im2]
    x?_ref : (1, C, TL) image slab (channels on sublanes, pixels on lanes), f32 or bf16
    out_ref: (1, 1, TL) per-lane partial EPE sums, accumulated across pixel blocks
    """
    b = pl.program_id(2)

    x1 = x1_ref[0].astype(jnp.float32)            # (C, TL)
    x2 = x2_ref[0].astype(jnp.float32)            # (C, TL)
    c = x1.shape[0]

    # VPU channel contraction with the folded (student - teacher) head.  Weights are
    # SMEM scalars -> scalar splats; no per-step 1-lane VMEM loads / lane broadcasts.
    u = w_ref[0, 0] * x1[0:1, :] + w_ref[0, 2] * x2[0:1, :]
    v = w_ref[0, 1] * x1[0:1, :] + w_ref[0, 3] * x2[0:1, :]
    for ch in range(1, c):
        u = u + w_ref[ch, 0] * x1[ch:ch + 1, :] + w_ref[ch, 2] * x2[ch:ch + 1, :]
        v = v + w_ref[ch, 1] * x1[ch:ch + 1, :] + w_ref[ch, 3] * x2[ch:ch + 1, :]

    # TODO(synk): add an eps inside the sqrt before this loss is ever differentiated
    # (gradient of sqrt is infinite at exactly-zero EPE).  Forward value unaffected.
    epe = jnp.sqrt(u * u + v * v)                 # (1, TL)

    @pl.when(b == 0)
    def _init():
        out_ref[...] = jnp.zeros_like(out_ref)

    out_ref[...] += epe[None]                     # (1, 1, TL)


def _vmem_budget_bytes():
    """Conservative VMEM budget for the double-buffered image slabs.

    Stays well under the smallest scoped-VMEM default (v5e: 16 MiB); on a small-VMEM
    chip (v7x: 64 MiB physical, 32 MiB scoped default, 3.2 TB/s HBM) allow a bit more
    so the slabs can grow toward the roofline.
    """
    budget = 12 << 20
    try:  # get_tpu_info may be unavailable off-TPU / under interpret mode.
        info = pltpu.get_tpu_info()
        if getattr(info, "vmem_capacity_bytes", 128 << 20) <= (64 << 20):
            budget = 20 << 20
    except Exception:
        pass
    return budget


def _choose_pixel_tile(hw, c, in_itemsize, max_tl, vmem_budget):
    """Largest TL (multiple of 128, dividing hw) whose double-buffered slabs fit."""
    # 2 inputs x 2 pipeline buffers of (C, TL) + 2 buffers of the (1, TL) f32 out row.
    per_lane_bytes = 4 * c * in_itemsize + 2 * 4
    tl = int(min(hw, max_tl, vmem_budget // per_lane_bytes))
    tl = max(128, tl - tl % 128)
    while tl > 128 and hw % tl != 0:
        tl -= 128
    return tl


def global_flow_loss(im1, im2, w_student, w_teacher, *, max_tl=131072):
    """Forward pass of GlobalFlowLoss: mean end-point-error between the student and
    teacher 1x1-conv flow heads.  im1, im2: [N, C, H, W] (NCHW, f32 or bf16)."""
    n, c, h, w = im1.shape
    hw = h * w
    assert hw % 128 == 0, "H*W must be a multiple of 128"
    # TODO(synk): ragged H*W would need a masked tail tile; not implemented.

    in_itemsize = jnp.dtype(im1.dtype).itemsize
    tl = _choose_pixel_tile(hw, c, in_itemsize, max_tl, _vmem_budget_bytes())
    num_blocks = hw // tl

    # v7x has 2 TensorCores: if the batch axis alone can't feed both, split the
    # pixel-block axis 2-ways; each split owns its own lane-dense accumulator row.
    nsplit = 2 if (n == 1 and num_blocks >= 2 and num_blocks % 2 == 0) else 1
    nbps = num_blocks // nsplit

    # Teacher runs under no_grad in the PyTorch module.
    wt = jax.lax.stop_gradient(w_teacher)
    # pred - gt is linear in the input -> fold both heads into one diff head (exact).
    wd = w_student.astype(jnp.float32) - wt.astype(jnp.float32)        # (2C, 2)
    # Pack as (C, 4): columns = [u|im1, v|im1, u|im2, v|im2].
    w_pack = jnp.concatenate([wd[:c, :], wd[c:, :]], axis=1)           # (C, 4)

    # NCHW is already pixel-contiguous per channel plane: free reshape, no transpose,
    # no concatenated HBM copy, and no wrapper-side upcast (bf16 stays bf16 on the wire).
    x1 = im1.reshape(n, c, hw)
    x2 = im2.reshape(n, c, hw)

    # Deeper input buffering only when the hw factorization forces small blocks.
    block_bytes = c * tl * in_itemsize
    total_steps = n * nsplit * nbps
    deep_buffer = block_bytes < (1 << 20) and total_steps >= 4

    def x_spec():
        idx_map = lambda i, p, b: (i, 0, p * nbps + b)
        if deep_buffer:
            return pl.BlockSpec((1, c, tl), idx_map, pipeline_mode=pl.Buffered(3))
        return pl.BlockSpec((1, c, tl), idx_map)

    cost = pl.CostEstimate(
        flops=int(n * hw * (8 * c + 4)),
        transcendentals=int(n * hw),
        bytes_accessed=int(2 * n * c * hw * in_itemsize + n * nsplit * tl * 4 + c * 16),
    )

    partials = pl.pallas_call(
        _global_flow_loss_kernel,
        out_shape=jax.ShapeDtypeStruct((n, nsplit, tl), jnp.float32),
        grid_spec=pltpu.PrefetchScalarGridSpec(
            num_scalar_prefetch=0,
            grid=(n, nsplit, nbps),
            in_specs=[
                pl.BlockSpec(memory_space=pltpu.MemorySpace.SMEM),   # packed diff weights
                x_spec(),                                            # im1 pixel slab
                x_spec(),                                            # im2 pixel slab
            ],
            out_specs=pl.BlockSpec((1, 1, tl), lambda i, p, b: (i, p, 0)),
        ),
        compiler_params=pltpu.CompilerParams(
            # batch & split axes parallel (dual-TC on v7x); pixel-block axis is the
            # accumulation axis into the per-(batch, split) lane-dense partial-sum row.
            dimension_semantics=("parallel", "parallel", "arbitrary")),
        cost_estimate=cost,
    )(w_pack, x1, x2)

    # Tiny cross-lane reduction + mean done in the wrapper.
    # TODO(synk): training the student through this loss needs a custom_vjp
    # (pallas_call has no autodiff rule); forward-only here, matching forward().
    return jnp.sum(partials) / jnp.float32(n * hw)


def _reference_loss(im1, im2, w_student, w_teacher):
    n, c, h, w = im1.shape
    x = jnp.concatenate([im1, im2], axis=1)
    x = jnp.transpose(x, (0, 2, 3, 1)).reshape(n * h * w, 2 * c).astype(jnp.float32)
    pred = jnp.dot(x, w_student, precision=jax.lax.Precision.HIGHEST)
    gt = jnp.dot(x, w_teacher, precision=jax.lax.Precision.HIGHEST)
    return jnp.mean(jnp.sqrt(jnp.sum((pred - gt) ** 2, axis=-1)))


if __name__ == "__main__":
    key = jax.random.PRNGKey(0)
    k1, k2, k3, k4 = jax.random.split(key, 4)

    # Small shapes consistent with the module: batch=2, channels=4, spatial=16.
    im1 = jax.random.normal(k1, (2, 4, 16, 16), jnp.float32)
    im2 = jax.random.normal(k2, (2, 4, 16, 16), jnp.float32)

    # Deterministic synthetic "flow head" weights (1x1 conv, [2C, 2] as W^T).
    w_student = 0.1 * jax.random.normal(k3, (8, 2), jnp.float32)
    w_teacher = 0.1 * jax.random.normal(k4, (8, 2), jnp.float32)

    ref = _reference_loss(im1, im2, w_student, w_teacher)

    # f32 path — must match the HIGHEST-precision reference tightly.
    loss = global_flow_loss(im1, im2, w_student, w_teacher)
    loss = jax.block_until_ready(loss)
    assert jnp.allclose(loss, ref, rtol=1e-5, atol=1e-5), (loss, ref)

    # bf16 images (halved HBM traffic path) — loose tolerance, in-kernel f32 compute.
    loss_bf16 = global_flow_loss(im1.astype(jnp.bfloat16), im2.astype(jnp.bfloat16),
                                 w_student, w_teacher)
    loss_bf16 = jax.block_until_ready(loss_bf16)
    assert jnp.allclose(loss_bf16, ref, rtol=1e-1, atol=1e-1), (loss_bf16, ref)

    print("KERNEL_OK")
</pallas_src>

<mosaic_0001>
module attributes {stable_mosaic.version = 11 : i64} {
  func.func @_global_flow_loss_kernel(%arg0: i32, %arg1: i32, %arg2: i32, %arg3: memref<4x4xf32, #tpu.memory_space<smem>>, %arg4: memref<1x4x256xf32, #tpu.memory_space<vmem>>, %arg5: memref<1x4x256xf32, #tpu.memory_space<vmem>>, %arg6: memref<1x1x256xf32, #tpu.memory_space<vmem>>) attributes {dimension_semantics = [#tpu.dimension_semantics<parallel>, #tpu.dimension_semantics<parallel>, #tpu.dimension_semantics<arbitrary>], iteration_bounds = array<i64: 2, 1, 1>, scalar_prefetch = 0 : i64, scratch_operands = 0 : i64, tpu.core_type = #tpu.core_type<tc>, window_params = [{transform_indices = @transform_0, window_bounds = array<i64: 4, 4>}, {transform_indices = @transform_1, window_bounds = array<i64: 1, 4, 256>}, {transform_indices = @transform_2, window_bounds = array<i64: 1, 4, 256>}, {transform_indices = @transform_3, window_bounds = array<i64: 1, 1, 256>}]} {
    %c0 = arith.constant 0 : index
    %c0_0 = arith.constant 0 : index
    %c0_1 = arith.constant 0 : index
    %0 = vector.load %arg4[%c0, %c0_0, %c0_1] : memref<1x4x256xf32, #tpu.memory_space<vmem>>, vector<1x4x256xf32>
    %1 = vector.shape_cast %0 : vector<1x4x256xf32> to vector<4x256xf32>
    %c0_2 = arith.constant 0 : index
    %c0_3 = arith.constant 0 : index
    %c0_4 = arith.constant 0 : index
    %2 = vector.load %arg5[%c0_2, %c0_3, %c0_4] : memref<1x4x256xf32, #tpu.memory_space<vmem>>, vector<1x4x256xf32>
    %3 = vector.shape_cast %2 : vector<1x4x256xf32> to vector<4x256xf32>
    %c0_5 = arith.constant 0 : index
    %c0_6 = arith.constant 0 : index
    %4 = memref.load %arg3[%c0_5, %c0_6] : memref<4x4xf32, #tpu.memory_space<smem>>
    %5 = vector.extract_strided_slice %1 {offsets = [0, 0], sizes = [1, 256], strides = [1, 1]} : vector<4x256xf32> to vector<1x256xf32>
    %6 = vector.broadcast %4 : f32 to vector<1x256xf32>
    %7 = arith.mulf %6, %5 : vector<1x256xf32>
    %c0_7 = arith.constant 0 : index
    %c2 = arith.constant 2 : index
    %8 = memref.load %arg3[%c0_7, %c2] : memref<4x4xf32, #tpu.memory_space<smem>>
    %9 = vector.extract_strided_slice %3 {offsets = [0, 0], sizes = [1, 256], strides = [1, 1]} : vector<4x256xf32> to vector<1x256xf32>
    %10 = vector.broadcast %8 : f32 to vector<1x256xf32>
    %11 = arith.mulf %10, %9 : vector<1x256xf32>
    %12 = arith.addf %7, %11 : vector<1x256xf32>
    %c0_8 = arith.constant 0 : index
    %c1 = arith.constant 1 : index
    %13 = memref.load %arg3[%c0_8, %c1] : memref<4x4xf32, #tpu.memory_space<smem>>
    %14 = vector.extract_strided_slice %1 {offsets = [0, 0], sizes = [1, 256], strides = [1, 1]} : vector<4x256xf32> to vector<1x256xf32>
    %15 = vector.broadcast %13 : f32 to vector<1x256xf32>
    %16 = arith.mulf %15, %14 : vector<1x256xf32>
    %c0_9 = arith.constant 0 : index
    %c3 = arith.constant 3 : index
    %17 = memref.load %arg3[%c0_9, %c3] : memref<4x4xf32, #tpu.memory_space<smem>>
    %18 = vector.extract_strided_slice %3 {offsets = [0, 0], sizes = [1, 256], strides = [1, 1]} : vector<4x256xf32> to vector<1x256xf32>
    %19 = vector.broadcast %17 : f32 to vector<1x256xf32>
    %20 = arith.mulf %19, %18 : vector<1x256xf32>
    %21 = arith.addf %16, %20 : vector<1x256xf32>
    %c1_10 = arith.constant 1 : index
    %c0_11 = arith.constant 0 : index
    %22 = memref.load %arg3[%c1_10, %c0_11] : memref<4x4xf32, #tpu.memory_space<smem>>
    %23 = vector.extract_strided_slice %1 {offsets = [1, 0], sizes = [1, 256], strides = [1, 1]} : vector<4x256xf32> to vector<1x256xf32>
    %24 = vector.broadcast %22 : f32 to vector<1x256xf32>
    %25 = arith.mulf %24, %23 : vector<1x256xf32>
    %26 = arith.addf %12, %25 : vector<1x256xf32>
    %c1_12 = arith.constant 1 : index
    %c2_13 = arith.constant 2 : index
    %27 = memref.load %arg3[%c1_12, %c2_13] : memref<4x4xf32, #tpu.memory_space<smem>>
    %28 = vector.extract_strided_slice %3 {offsets = [1, 0], sizes = [1, 256], strides = [1, 1]} : vector<4x256xf32> to vector<1x256xf32>
    %29 = vector.broadcast %27 : f32 to vector<1x256xf32>
    %30 = arith.mulf %29, %28 : vector<1x256xf32>
    %31 = arith.addf %26, %30 : vector<1x256xf32>
    %c1_14 = arith.constant 1 : index
    %c1_15 = arith.constant 1 : index
    %32 = memref.load %arg3[%c1_14, %c1_15] : memref<4x4xf32, #tpu.memory_space<smem>>
    %33 = vector.extract_strided_slice %1 {offsets = [1, 0], sizes = [1, 256], strides = [1, 1]} : vector<4x256xf32> to vector<1x256xf32>
    %34 = vector.broadcast %32 : f32 to vector<1x256xf32>
    %35 = arith.mulf %34, %33 : vector<1x256xf32>
    %36 = arith.addf %21, %35 : vector<1x256xf32>
    %c1_16 = arith.constant 1 : index
    %c3_17 = arith.constant 3 : index
    %37 = memref.load %arg3[%c1_16, %c3_17] : memref<4x4xf32, #tpu.memory_space<smem>>
    %38 = vector.extract_strided_slice %3 {offsets = [1, 0], sizes = [1, 256], strides = [1, 1]} : vector<4x256xf32> to vector<1x256xf32>
    %39 = vector.broadcast %37 : f32 to vector<1x256xf32>
    %40 = arith.mulf %39, %38 : vector<1x256xf32>
    %41 = arith.addf %36, %40 : vector<1x256xf32>
    %c2_18 = arith.constant 2 : index
    %c0_19 = arith.constant 0 : index
    %42 = memref.load %arg3[%c2_18, %c0_19] : memref<4x4xf32, #tpu.memory_space<smem>>
    %43 = vector.extract_strided_slice %1 {offsets = [2, 0], sizes = [1, 256], strides = [1, 1]} : vector<4x256xf32> to vector<1x256xf32>
    %44 = vector.broadcast %42 : f32 to vector<1x256xf32>
    %45 = arith.mulf %44, %43 : vector<1x256xf32>
    %46 = arith.addf %31, %45 : vector<1x256xf32>
    %c2_20 = arith.constant 2 : index
    %c2_21 = arith.constant 2 : index
    %47 = memref.load %arg3[%c2_20, %c2_21] : memref<4x4xf32, #tpu.memory_space<smem>>
    %48 = vector.extract_strided_slice %3 {offsets = [2, 0], sizes = [1, 256], strides = [1, 1]} : vector<4x256xf32> to vector<1x256xf32>
    %49 = vector.broadcast %47 : f32 to vector<1x256xf32>
    %50 = arith.mulf %49, %48 : vector<1x256xf32>
    %51 = arith.addf %46, %50 : vector<1x256xf32>
    %c2_22 = arith.constant 2 : index
    %c1_23 = arith.constant 1 : index
    %52 = memref.load %arg3[%c2_22, %c1_23] : memref<4x4xf32, #tpu.memory_space<smem>>
    %53 = vector.extract_strided_slice %1 {offsets = [2, 0], sizes = [1, 256], strides = [1, 1]} : vector<4x256xf32> to vector<1x256xf32>
    %54 = vector.broadcast %52 : f32 to vector<1x256xf32>
    %55 = arith.mulf %54, %53 : vector<1x256xf32>
    %56 = arith.addf %41, %55 : vector<1x256xf32>
    %c2_24 = arith.constant 2 : index
    %c3_25 = arith.constant 3 : index
    %57 = memref.load %arg3[%c2_24, %c3_25] : memref<4x4xf32, #tpu.memory_space<smem>>
    %58 = vector.extract_strided_slice %3 {offsets = [2, 0], sizes = [1, 256], strides = [1, 1]} : vector<4x256xf32> to vector<1x256xf32>
    %59 = vector.broadcast %57 : f32 to vector<1x256xf32>
    %60 = arith.mulf %59, %58 : vector<1x256xf32>
    %61 = arith.addf %56, %60 : vector<1x256xf32>
    %c3_26 = arith.constant 3 : index
    %c0_27 = arith.constant 0 : index
    %62 = memref.load %arg3[%c3_26, %c0_27] : memref<4x4xf32, #tpu.memory_space<smem>>
    %63 = vector.extract_strided_slice %1 {offsets = [3, 0], sizes = [1, 256], strides = [1, 1]} : vector<4x256xf32> to vector<1x256xf32>
    %64 = vector.broadcast %62 : f32 to vector<1x256xf32>
    %65 = arith.mulf %64, %63 : vector<1x256xf32>
    %66 = arith.addf %51, %65 : vector<1x256xf32>
    %c3_28 = arith.constant 3 : index
    %c2_29 = arith.constant 2 : index
    %67 = memref.load %arg3[%c3_28, %c2_29] : memref<4x4xf32, #tpu.memory_space<smem>>
    %68 = vector.extract_strided_slice %3 {offsets = [3, 0], sizes = [1, 256], strides = [1, 1]} : vector<4x256xf32> to vector<1x256xf32>
    %69 = vector.broadcast %67 : f32 to vector<1x256xf32>
    %70 = arith.mulf %69, %68 : vector<1x256xf32>
    %71 = arith.addf %66, %70 : vector<1x256xf32>
    %c3_30 = arith.constant 3 : index
    %c1_31 = arith.constant 1 : index
    %72 = memref.load %arg3[%c3_30, %c1_31] : memref<4x4xf32, #tpu.memory_space<smem>>
    %73 = vector.extract_strided_slice %1 {offsets = [3, 0], sizes = [1, 256], strides = [1, 1]} : vector<4x256xf32> to vector<1x256xf32>
    %74 = vector.broadcast %72 : f32 to vector<1x256xf32>
    %75 = arith.mulf %74, %73 : vector<1x256xf32>
    %76 = arith.addf %61, %75 : vector<1x256xf32>
    %c3_32 = arith.constant 3 : index
    %c3_33 = arith.constant 3 : index
    %77 = memref.load %arg3[%c3_32, %c3_33] : memref<4x4xf32, #tpu.memory_space<smem>>
    %78 = vector.extract_strided_slice %3 {offsets = [3, 0], sizes = [1, 256], strides = [1, 1]} : vector<4x256xf32> to vector<1x256xf32>
    %79 = vector.broadcast %77 : f32 to vector<1x256xf32>
    %80 = arith.mulf %79, %78 : vector<1x256xf32>
    %81 = arith.addf %76, %80 : vector<1x256xf32>
    %82 = arith.mulf %71, %71 : vector<1x256xf32>
    %83 = arith.mulf %81, %81 : vector<1x256xf32>
    %84 = arith.addf %82, %83 : vector<1x256xf32>
    %85 = math.sqrt %84 : vector<1x256xf32>
    %c0_i32 = arith.constant 0 : i32
    %86 = arith.cmpi eq, %arg2, %c0_i32 : i32
    %87 = arith.extui %86 : i1 to i32
    %c0_i32_34 = arith.constant 0 : i32
    %88 = arith.cmpi ne, %87, %c0_i32_34 : i32
    scf.if %88 {
      %cst = arith.constant 0.000000e+00 : f32
      %93 = vector.broadcast %cst : f32 to vector<1x1x256xf32>
      %c0_41 = arith.constant 0 : index
      %c0_42 = arith.constant 0 : index
      %c0_43 = arith.constant 0 : index
      %94 = vector.load %arg6[%c0_41, %c0_42, %c0_43] : memref<1x1x256xf32, #tpu.memory_space<vmem>>, vector<1x1x256xf32>
      tpu.vector_store %arg6[%c0_41, %c0_42, %c0_43], %93 {strides = array<i32>} : memref<1x1x256xf32, #tpu.memory_space<vmem>>, vector<1x1x256xf32>,
    } else {
    }
    %c0_35 = arith.constant 0 : index
    %c0_36 = arith.constant 0 : index
    %c0_37 = arith.constant 0 : index
    %89 = vector.load %arg6[%c0_35, %c0_36, %c0_37] : memref<1x1x256xf32, #tpu.memory_space<vmem>>, vector<1x1x256xf32>
    %90 = vector.shape_cast %85 : vector<1x256xf32> to vector<1x1x256xf32>
    %91 = arith.addf %89, %90 : vector<1x1x256xf32>
    %c0_38 = arith.constant 0 : index
    %c0_39 = arith.constant 0 : index
    %c0_40 = arith.constant 0 : index
    %92 = vector.load %arg6[%c0_38, %c0_39, %c0_40] : memref<1x1x256xf32, #tpu.memory_space<vmem>>, vector<1x1x256xf32>
    tpu.vector_store %arg6[%c0_38, %c0_39, %c0_40], %91 {strides = array<i32>} : memref<1x1x256xf32, #tpu.memory_space<vmem>>, vector<1x1x256xf32>,
    return
  }
  func.func @transform_0(%arg0: i32, %arg1: i32, %arg2: i32) -> (i32, i32) {
    %c0_i32 = arith.constant 0 : i32
    %c0_i32_0 = arith.constant 0 : i32
    %c0_i32_1 = arith.constant 0 : i32
    return %c0_i32, %c0_i32_0 : i32, i32
  }
  func.func @transform_1(%arg0: i32, %arg1: i32, %arg2: i32) -> (i32, i32, i32) {
    %c1_i32 = arith.constant 1 : i32
    %0 = arith.muli %arg1, %c1_i32 : i32
    %1 = arith.addi %0, %arg2 : i32
    %c0_i32 = arith.constant 0 : i32
    %c0_i32_0 = arith.constant 0 : i32
    return %arg0, %c0_i32, %1 : i32, i32, i32
  }
  func.func @transform_2(%arg0: i32, %arg1: i32, %arg2: i32) -> (i32, i32, i32) {
    %c1_i32 = arith.constant 1 : i32
    %0 = arith.muli %arg1, %c1_i32 : i32
    %1 = arith.addi %0, %arg2 : i32
    %c0_i32 = arith.constant 0 : i32
    %c0_i32_0 = arith.constant 0 : i32
    return %arg0, %c0_i32, %1 : i32, i32, i32
  }
  func.func @transform_3(%arg0: i32, %arg1: i32, %arg2: i32) -> (i32, i32, i32) {
    %c0_i32 = arith.constant 0 : i32
    %c0_i32_0 = arith.constant 0 : i32
    return %arg0, %arg1, %c0_i32 : i32, i32, i32
  }
}

</mosaic_0001>

<bundles_post_ra>
// kernel: tpu_custom_call.1
= control target key start
LH: loop header
LB: loop body
LE: loop exit
PB: predicated region body
PF: predicated region fallthrough
CT: control target
= control target key end

     0   :  { %s1196_s0 = inlined_call_operand.hbm [shape: f32[4,4], index: 0, kind: input, shape index: {}]   ;;  %s1197_s1 = inlined_call_operand.hbm [shape: f32[2,4,256], index: 1, kind: input, shape index: {}]   ;;  %s1198_s2 = inlined_call_operand.hbm [shape: f32[2,4,256], index: 2, kind: input, shape index: {}]   ;;  %s1199_s3 = inlined_call_operand.hbm [shape: f32[2,1,256], index: 3, kind: output, shape index: {}]  }
   0x1   :  { %1206 = sst [smem:[#allocation14_spill]] %s1196_s0 }
   0x2   :  { %1207 = sst [smem:[#allocation15_spill]] %s1197_s1 }
   0x3   :  { %8 = vsyncpa [#allocation5], 0 }
   0x4   :  { %9 = vsyncpa [#allocation3], 0 }
   0x5   :  { %11 = vsyncpa [#allocation3 + $0x1], 0 }
   0x6   :  { %12 = vsyncpa [#allocation8], 0 }
   0x7   :  { %14 = vsyncpa [#allocation8 + $0x1], 0 }
   0x8   :  { %15 = vsyncpa [#allocation4], 0 }
   0x9   :  { %17 = vsyncpa [#allocation4 + $0x1], 0  ;;  %s898_s12 = smov 0   ;;  %s900_s13 = smov 0  }
   0xa   :  { %s902_s14 = smov 0   ;;  %s904_s15 = smov 0  }
   0xb   :  { %s906_s16 = smov 0   ;;  %s908_s17 = smov 0  }
   0xc LB: > { %s574_s18 = sadd.s32 4294967295, %s870_s17   ;;  %s575_s19 = sadd.s32 4294967294, %s870_s17   ;;  %s870_s17 = sphi %s908_s17, %s23_s17   ;;  %s866_s16 = sphi %s906_s16, %s1232_s16   ;;  %s862_s15 = sphi %s904_s15, %s1231_s15   ;;  %s858_s14 = sphi %s902_s14, %s1230_s14   ;;  %s854_s13 = sphi %s900_s13, %s1229_s13   ;;  %s850_s12 = sphi %s898_s12, %s1228_s12  }
   0xd   : > { %p81_p0 = scmp.ne.s32.totalorder %s858_s14, %s854_s13  ;;  %p87_p1 = scmp.ne.s32.totalorder %s854_s13, %s850_s12 }
   0xe   : > { %p934_p2 = scmp.eq.s32.totalorder %s574_s18, 0  ;;  %p143_p3 = scmp.eq.s32.totalorder %s574_s18, 1 }
   0xf   : > { %p149_p4 = scmp.eq.s32.totalorder %s575_s19, 1  ;;  %p576_p5 = scmp.ge.s32.totalorder %s870_s17, 1 }
  0x10   : > { %s1208_s20 = scalar_select %p934_p2, 1, 0 }
  0x11   : > { %p941_p6 = por %p934_p2, %p87_p1  ;;  %p948_p7 = por %p143_p3, %p81_p0 }
  0x12   : > { %p952_p8 = por %p149_p4, %p87_p1  ;;  %p156_p9 = scmp.lt.s32.totalorder %s870_s17, 3 }
  0x13   : > { %s1209_s21 = scalar_select %p941_p6, 1, 0 }
  0x14   : > { %s1210_s22 = scalar_select %p948_p7, 1, 0 }
  0x15   : > { %s1211_s23 = scalar_select %p952_p8, 1, 0 }
  0x16   : > { %p957_p10 = pnand %p576_p5, %p156_p9  ;;  %s74_s25 = sadd.s32 1, %s858_s14 }
  0x17   : > { %s42_s26 = sadd.s32 1, %s866_s16  ;;  %p82_p13 = scmp.eq.s32.totalorder %s870_s17, 0 }
  0x18   : > { %s1212_s24 = scalar_select %p957_p10, 1, 0 }
  0x19   : > { %p635_p12 = pneg %p957_p10  ;;  %p973_p1 = scmp.ge.s32.totalorder %s42_s26, 2 }
  0x1a   : > { %p980_p4 = por %p82_p13, %p81_p0  ;;  %p651_p5 = scmp.lt.s32.totalorder %s870_s17, 2 }
  0x1b   : > { %p969_p3 = pnand %p635_p12, %p934_p2  ;;  %s986_s30 = sand.u32 1, %s858_s14  }
  0x1c   : > { %s1216_s0 = sld [smem:[#allocation14_spill]] }
  0x1d   : > { %p709_p12 = pneg %p969_p3 }
  0x22   : > { %s707_s6 = scalar_lea.hbm %s1216_s0, 64 }
  0x23   : > { %p708_p9 = scmp.ne.s32.totalorder %s1216_s0, %s707_s6  ;;  %p714_p0 = scmp.lt.u32.totalorder %s707_s6, %s1216_s0 }
  0x25   : > { %p710_p11 = pnand %p709_p12, %p708_p9 }
  0x27   : > { %p711_p8 = pneg %p710_p11 }
  0x29   : > { %p716_p13 = pnand %p714_p0, %p711_p8 }
  0x2b   : > { %719 = shalt.err (!%p716_p13)
}
  0x2c   : > { %s872_s11 = smov [#allocation2]   ;;  %s1234_s26 = smov (%p973_p1, %s42_s26), 0 }
  0x2d   : > { %638 = dma.hbm_to_smem (!%p969_p3), %s1216_s0, 64, %s872_s11, [#allocation5]  }
  0x2e   : > { %s1200_s4 = sshll.u32 %s986_s30, 3  ;;  %s69_s5 = ssub.s32 %s866_s16, %s1234_s26 }
  0x2f   : > { %p72_p8 = scmp.eq.s32.totalorder %s69_s5, 0  ;;  %s622_s27 = sshll.u32 %s866_s16, 7 }
  0x30   : > { %s1217_s1 = sld [smem:[#allocation15_spill]]  ;;  %s182_s9 = scalar_lea.vmem [#allocation6], %s1200_s4 }
  0x31   : > { %s193_s10 = sshll.u32 %s182_s9, 4  ;;  %p1028_p11 = pnand %p651_p5, %p980_p4  ;;  %s1022_s10 = int_to_ptr.vmem [resolvable:$true] %s193_s10 }
  0x32   : > { %s1020_s28 = scalar_select %p72_p8, %s858_s14, %s74_s25  }
  0x33   : > { %s1035_s5 = scalar_lea.hbm %s1198_s2, %s622_s27  ;;  %s179_s6 = scalar_lea.sflag [#allocation3], %s986_s30 }
  0x34   : > { %p722_p1 = pneg %p1028_p11 }
  0x36   : > { %s1015_s8 = scalar_lea.hbm %s1217_s1, %s622_s27  ;;  %s725_s9 = scalar_lea.hbm %s1217_s1, 256 }
  0x37   : > { %s720_s7 = scalar_lea.hbm %s1015_s8, 128  ;;  %p726_p4 = scmp.lt.u32.totalorder %s1015_s8, %s1217_s1 }
  0x38   : > { %p721_p3 = scmp.ne.s32.totalorder %s1015_s8, %s720_s7  ;;  %p727_p5 = scmp.lt.u32.totalorder %s725_s9, %s720_s7 }
  0x39   : > { %p729_p13 = scmp.lt.u32.totalorder %s720_s7, %s1015_s8 }
  0x3a   : > { %p723_p9 = pnand %p722_p1, %p721_p3  ;;  %p728_p0 = por %p727_p5, %p726_p4 }
  0x3c   : > { %p724_p12 = pneg %p723_p9  ;;  %p730_p8 = por %p729_p13, %p728_p0 }
  0x3e   : > { %p731_p7 = pnand %p730_p8, %p724_p12 }
  0x40   : > { %734 = shalt.err (!%p731_p7)
}
  0x41   : > { %s735_s27 = scalar_lea.vmem %s1022_s10, 128  ;;  %s873_s18 = smov [#allocation6]  }
  0x42   : > { %p736_p3 = scmp.ne.s32.totalorder %s1022_s10, %s735_s27  ;;  %s740_s19 = sshll.u32 %s873_s18, 4  ;;  %s741_s19 = int_to_ptr.vmem [resolvable:$false] %s740_s19 }
  0x43   : > { %s742_s0 = scalar_lea.vmem %s741_s19, 256  ;;  %p743_p2 = scmp.lt.s32.totalorder %s1022_s10, %s741_s19 }
  0x44   : > { %p738_p9 = pnand %p736_p3, %p722_p1  ;;  %p744_p4 = scmp.lt.s32.totalorder %s742_s0, %s735_s27 }
  0x46   : > { %p739_p6 = pneg %p738_p9  ;;  %p745_p5 = por %p744_p4, %p743_p2 }
  0x48   : > { %p746_p0 = pnand %p745_p5, %p739_p6 }
  0x4a   : > { %749 = shalt.err (!%p746_p0)
}
  0x4b   : > { %642 = dma.hbm_to_vmem [thread:$0]  (!%p1028_p11), %s1015_s8, 128, %s1022_s10, %s179_s6  }
  0x4c   : > { %s1219_s4 = sshll.u32 %s986_s30, 3  ;;  %s201_s29 = scalar_lea.sflag [#allocation8], %s986_s30 }
  0x4d   : > { %s204_s7 = scalar_lea.vmem [#allocation7], %s1219_s4  ;;  %s750_s9 = scalar_lea.hbm %s1035_s5, 128 }
  0x4e   : > { %s215_s25 = sshll.u32 %s204_s7, 4  ;;  %p751_p2 = scmp.ne.s32.totalorder %s1035_s5, %s750_s9  ;;  %s216_s25 = int_to_ptr.vmem [resolvable:$true] %s215_s25 }
  0x4f   : > { %s755_s19 = scalar_lea.hbm %s1198_s2, 256  ;;  %p756_p12 = scmp.lt.u32.totalorder %s1035_s5, %s1198_s2 }
  0x50   : > { %p753_p6 = pnand %p751_p2, %p722_p1  ;;  %p757_p13 = scmp.lt.u32.totalorder %s755_s19, %s750_s9 }
  0x51   : > { %p759_p3 = scmp.lt.u32.totalorder %s750_s9, %s1035_s5 }
  0x52   : > { %p754_p7 = pneg %p753_p6  ;;  %p758_p8 = por %p757_p13, %p756_p12 }
  0x54   : > { %p760_p9 = por %p759_p3, %p758_p8 }
  0x56   : > { %p761_p4 = pnand %p760_p9, %p754_p7 }
  0x58   : > { %764 = shalt.err (!%p761_p4)
}
  0x59   : > { %s765_s30 = scalar_lea.vmem %s216_s25, 128  ;;  %s874_s8 = smov [#allocation7]  }
  0x5a   : > { %p766_p5 = scmp.ne.s32.totalorder %s216_s25, %s765_s30  ;;  %s770_s10 = sshll.u32 %s874_s8, 4  ;;  %s771_s10 = int_to_ptr.vmem [resolvable:$false] %s770_s10 }
  0x5b   : > { %s772_s6 = scalar_lea.vmem %s771_s10, 256  ;;  %p773_p6 = scmp.lt.s32.totalorder %s216_s25, %s771_s10 }
  0x5c   : > { %p768_p0 = pnand %p766_p5, %p722_p1  ;;  %p774_p10 = scmp.lt.s32.totalorder %s772_s6, %s765_s30 }
  0x5e   : > { %p769_p2 = pneg %p768_p0  ;;  %p775_p12 = por %p774_p10, %p773_p6 }
  0x60   : > { %p776_p13 = pnand %p775_p12, %p769_p2 }
  0x62   : > { %779 = shalt.err (!%p776_p13)
}
  0x63   : > { %645 = dma.hbm_to_vmem [thread:$0]  (!%p1028_p11), %s1035_s5, 128, %s216_s25, %s201_s29  }
  0x64   : > { %p1220_p7 = scmp.ne.s32.totalorder %s1212_s24, 0 }
  0x65   : > { %p1221_p8 = scmp.ne.s32.totalorder (!%p1220_p7), %s1208_s20, 0 }
  0x66   : > { %224 = sbr.rel (%p1220_p7) target bundleno = 184 (0xb8), region = 32 }
  0x6d   : > { %833 = dma.done.wait (%p1221_p8), [#allocation5], 64  }
  0x6e   : > { %835 = vsyncadd (%p1221_p8), [#allocation5], 4294967232  ;;  %s1092_s1 = sand.u32 1, %s854_s13   ;;  %p1222_p10 = scmp.ne.s32.totalorder %s1209_s21, 0 }
  0x6f   : > { %s587_s4 = sshll.u32 %s1092_s1, 3  ;;  %s231_s7 = scalar_lea.sflag [#allocation3], %s1092_s1 }
  0x70   : > { %s234_s11 = scalar_lea.vmem [#allocation6], %s587_s4 }
  0x71   : > { %837 = dma.done.wait (%p1222_p10), %s231_s7, 128  }
  0x72   : > { %839 = vsyncadd (%p1222_p10), %s231_s7, 4294967168  ;;  %s240_s24 = scalar_lea.sflag [#allocation8], %s1092_s1  ;;  %s243_s5 = scalar_lea.vmem [#allocation7], %s587_s4 }
  0x73   : > { %841 = dma.done.wait (%p1222_p10), %s240_s24, 128  }
  0x74   : > { %843 = vsyncadd (%p1222_p10), %s240_s24, 4294967168 }
  0x75   : > { %248 = sfence }
  0x76   : > { %s589_s20 = sshll.u32 %s1092_s1, 1  ;;  %s278_s25 = sld [smem:[#allocation2]]  ;;  %v402_v0 = vlaneseq  ;;  %v875_v2 = vmov 0.0   ;;  %v276_v3 = vld [vmem:[%s234_s11] sm:$0xff]  ;;  %v277_v4 = vld [vmem:[%s243_s5] sm:$0xff] }
  0x77   : > { %s590_s29 = sld [smem:[#allocation2 + $0x2]]  ;;  %s591_s9 = sld [smem:[#allocation2 + $0x1]] }
  0x78   : > { %s592_s27 = sld [smem:[#allocation2 + $0x3]]  ;;  %vm1107_vm0 = vcmp.lt.s32.totalorder %v402_v0, 256  ;;  %s593_s18 = sld [smem:[#allocation2 + $0x80]] }
  0x79   : > { %s595_s19 = sld [smem:[#allocation2 + $0x82]]  ;;  %s1111_s0 = scalar_lea.vmem [#allocation9], %s589_s20 }
  0x7a   : > { %406 = vst.msk [vmem:[%s1111_s0] sm:$0x3] %vm1107_vm0, %v875_v2  ;;  %s597_s21 = sld [smem:[#allocation2 + $0x81]]  ;;  %s599_s30 = sld [smem:[#allocation2 + $0x83]] }
  0x7b   : > { %s601_s8 = sld [smem:[#allocation2 + $0x100]]  ;;  %s1116_s10 = sld [smem:[#allocation2 + $0x102]] }
  0x7c   : > { %v279_v5 = vstv %s278_s25  ;;  %s1118_s6 = sld [smem:[#allocation2 + $0x101]]  ;;  %s1120_s4 = sld [smem:[#allocation2 + $0x103]] }
  0x7d   : > { %v280_v6 = vmul.f32 %v279_v5, %v276_v3  ;;  %v282_v7 = vstv %s590_s29  ;;  %s1122_s7 = sld [smem:[#allocation2 + $0x180]]  ;;  %v286_v9 = vstv %s591_s9  ;;  %s1124_s24 = sld [smem:[#allocation2 + $0x182]] }
  0x7e   : > { %v283_v8 = vmul.f32 %v282_v7, %v277_v4  ;;  %v289_v10 = vstv %s592_s27  ;;  %v287_v11 = vmul.f32 %v286_v9, %v276_v3  ;;  %v293_v13 = vstv %s593_s18  ;;  %s1126_s11 = sld [smem:[#allocation2 + $0x181]]  ;;  %s1128_s5 = sld [smem:[#allocation2 + $0x183]] }
  0x7f   : > { %v290_v12 = vmul.f32 %v289_v10, %v277_v4  ;;  %v301_v14 = vstv %s595_s19  ;;  %v294_v16 = vmul.f32 %v293_v13, %v276_v3  ;;  %s624_s20 = sshll.u32 %s862_s15, 5  ;;  %s447_s25 = sshll.u32 %s1111_s0, 4  ;;  %s1146_s25 = int_to_ptr.vmem [resolvable:$true] %s447_s25 }
  0x80   : > { %v284_v15 = vadd.f32 %v283_v8, %v280_v6  ;;  %v302_v17 = vmul.f32 %v301_v14, %v277_v4  ;;  %v309_v18 = vstv %s597_s21  ;;  %v317_v21 = vstv %s599_s30  ;;  %s1144_s27 = scalar_lea.hbm %s1199_s3, %s624_s20  ;;  %s431_s18 = scalar_lea.sflag [#allocation4], %s1092_s1 }
  0x81   : > { %v291_v19 = vadd.f32 %v290_v12, %v287_v11  ;;  %v310_v20 = vmul.f32 %v309_v18, %v276_v3  ;;  %v325_v22 = vstv %s601_s8  ;;  %v594_v23 = vrot.slane %v294_v16, 9  ;;  %s780_s19 = scalar_lea.vmem %s1146_s25, 32  ;;  %p1225_p1 = scmp.ne.s32.totalorder %s1210_s22, 0 }
  0x82   : > { %v596_v24 = vrot.slane %v302_v17, 9  ;;  %v318_v25 = vmul.f32 %v317_v21, %v277_v4  ;;  %v326_v26 = vmul.f32 %v325_v22, %v276_v3  ;;  %v333_v28 = vstv %s1116_s10  ;;  %p781_p11 = scmp.ne.s32.totalorder %s1146_s25, %s780_s19  ;;  %s877_s15 = smov [#allocation9]  }
  0x83   : > { %v598_v27 = vrot.slane %v310_v20, 9  ;;  %v341_v29 = vstv %s1118_s6  ;;  %v349_v30 = vstv %s1120_s4  ;;  %v299_v31 = vadd.f32 %v594_v23, %v284_v15  ;;  %v407_v15 = vld [vmem:[%s1111_s0] sm:$0x3]  ;;  %s784_s21 = sshll.u32 %s877_s15, 4  ;;  %s785_s21 = int_to_ptr.vmem [resolvable:$false] %s784_s21 }
  0x84   : > { %v600_v32 = vrot.slane %v318_v25, 9  ;;  %v602_v33 = vrot.slane %v326_v26, 10  ;;  %v334_v34 = vmul.f32 %v333_v28, %v277_v4  ;;  %v342_v36 = vmul.f32 %v341_v29, %v276_v3  ;;  %p782_p3 = pnand %p781_p11, %p1225_p1  ;;  %s786_s30 = scalar_lea.vmem %s785_s21, 64 }
  0x85   : > { %v315_v35 = vadd.f32 %v598_v27, %v291_v19  ;;  %v350_v37 = vmul.f32 %v349_v30, %v277_v4  ;;  %v357_v38 = vstv %s1122_s7  ;;  %v307_v39 = vadd.f32 %v596_v24, %v299_v31  ;;  %p787_p4 = scmp.lt.s32.totalorder %s1146_s25, %s785_s21  ;;  %p788_p5 = scmp.lt.s32.totalorder %s786_s30, %s780_s19 }
  0x86   : > { %v604_v40 = vrot.slane %v334_v34, 10  ;;  %v358_v41 = vmul.f32 %v357_v38, %v276_v3  ;;  %v365_v42 = vstv %s1124_s24  ;;  %v606_v44 = vrot.slane %v342_v36, 10  ;;  %p783_p9 = pneg %p782_p3 }
  0x87   : > { %v323_v43 = vadd.f32 %v600_v32, %v315_v35  ;;  %v608_v45 = vrot.slane %v350_v37, 10  ;;  %v366_v46 = vmul.f32 %v365_v42, %v277_v4  ;;  %v331_v47 = vadd.f32 %v602_v33, %v307_v39  ;;  %p789_p0 = por %p788_p5, %p787_p4 }
  0x88   : > { %v610_v48 = vrot.slane %v358_v41, 11  ;;  %v373_v49 = vstv %s1126_s11  ;;  %v381_v50 = vstv %s1128_s5  ;;  %v876_v6 = vmov 1966171168  }
  0x89   : > { %v347_v51 = vadd.f32 %v606_v44, %v323_v43  ;;  %v374_v52 = vmul.f32 %v373_v49, %v276_v3  ;;  %v382_v53 = vmul.f32 %v381_v50, %v277_v4  ;;  %v339_v54 = vadd.f32 %v604_v40, %v331_v47  ;;  %p790_p2 = pnand %p789_p0, %p783_p9 }
  0x8a   : > { %v612_v55 = vrot.slane %v366_v46, 11  ;;  %v410_v7 = vunpack.c.l.s4 %v876_v6  ;;  %v413_v4 = vshrl.u32 %v402_v0, 7 }
  0x8b   : > { %v355_v56 = vadd.f32 %v608_v45, %v347_v51  ;;  %v614_v57 = vrot.slane %v374_v52, 11  ;;  %v616_v58 = vrot.slane %v382_v53, 11  ;;  %v363_v59 = vadd.f32 %v610_v48, %v339_v54 }
  0x8c   : > { %v411_v3 = vunpack.c.0.s8 %v410_v7 }
  0x8d   : > { %v379_v60 = vadd.f32 %v614_v57, %v355_v56  ;;  %v371_v61 = vadd.f32 %v612_v55, %v363_v59 }
  0x8e   : > { %v414_v11 = vsub.s32 %v411_v3, %v413_v4 }
  0x8f   : > { %v387_v62 = vadd.f32 %v616_v58, %v379_v60  ;;  %v388_v63 = vmul.f32 %v371_v61, %v371_v61 }
  0x91   : > { %v389_v2 = vmul.f32 %v387_v62, %v387_v62 }
  0x93   : > { %v390_v5 = vadd.f32 %v389_v2, %v388_v63 }
  0x95   : > { %705 = vrsqrt.f32 %v390_v5  ;;  %vm393_vm1 = vcmp.eq.f32.partialorder %v390_v5, inf  ;;  %v396_v9 = vand.u32 2147483648, %v390_v5  ;;  %vm395_vm2 = vcmp.eq.f32.partialorder %v390_v5, 0.0 }
  0x9f   : > { %v706_v8 = vpop.eup %705 }
  0xa0   : > { %v392_v10 = vmul.f32 %v706_v8, %v390_v5 }
  0xa2   : > { %v394_v12 = vsel %vm393_vm1, %v390_v5, %v392_v10 }
  0xa3   : > { %v397_v13 = vsel %vm395_vm2, %v396_v9, %v394_v12 }
  0xa4   : > { %v415_v14 = vrot.slane %v397_v13, %v414_v11 }
  0xa6   : > { %v422_v16 = vrot.slane %v415_v14, %v414_v11 }
  0xa8   : > { %v424_v17 = vadd.f32 %v422_v16, %v407_v15 }
  0xaa   : > { %429 = vst.msk [vmem:[%s1111_s0] sm:$0x3] %vm1107_vm0, %v424_v17 }
  0xab   : > { %793 = shalt.err (!%p790_p2)
}
  0xac   : > { %s794_s1 = scalar_lea.hbm %s1144_s27, 32  ;;  %s798_s10 = scalar_lea.hbm %s1199_s3, 64 }
  0xad   : > { %p795_p6 = scmp.ne.s32.totalorder %s1144_s27, %s794_s1  ;;  %p799_p7 = scmp.lt.u32.totalorder %s1144_s27, %s1199_s3 }
  0xae   : > { %p800_p8 = scmp.lt.u32.totalorder %s798_s10, %s794_s1  ;;  %p802_p11 = scmp.lt.u32.totalorder %s794_s1, %s1144_s27 }
  0xaf   : > { %p796_p12 = pnand %p795_p6, %p1225_p1 }
  0xb0   : > { %p801_p10 = por %p800_p8, %p799_p7 }
  0xb1   : > { %p797_p13 = pneg %p796_p12 }
  0xb2   : > { %p803_p3 = por %p802_p11, %p801_p10 }
  0xb4   : > { %p804_p9 = pnand %p803_p3, %p797_p13 }
  0xb6   : > { %807 = shalt.err (!%p804_p9)
}
  0xb7   : > { %633 = dma.vmem_to_hbm [thread:$0]  (%p1225_p1), %s1146_s25, 32, %s1144_s27, %s431_s18  }
  0xb8 PF: > { %s459_s7 = sand.u32 1, %s850_s12   ;;  %p1226_p4 = scmp.ne.s32.totalorder %s1211_s23, 0 }
  0xb9   : > { %p1227_p5 = scmp.ge.s32.totalorder %s870_s17, 2  ;;  %s460_s24 = scalar_lea.sflag [#allocation4], %s459_s7 }
  0xbb   : > { %p647_p0 = pnand %p1227_p5, %p1226_p4 }
  0xbd   : > { %845 = dma.done.wait (!%p647_p0), %s460_s24, 32  }
  0xbe   : > { %847 = vsyncadd (!%p647_p0), %s460_s24, 4294967264  ;;  %s23_s17 = sadd.s32 1, %s870_s17   ;;  %s1228_s12 = smov %s854_s13 }
  0xbf   : > { %p20_p2 = scmp.ge.s32.totalorder %s23_s17, 4   ;;  %s1229_s13 = smov %s858_s14 }
  0xc0   : > { %s1230_s14 = smov %s1020_s28  ;;  %s1231_s15 = smov %s866_s16 }
  0xc1   : > { %s1232_s16 = smov %s1234_s26  ;;  %22 = sbr.rel (!%p20_p2) target bundleno = 12 (0xc), region = 99 }
  0xc8   :  { %465 = vsyncpa [#allocation3], 1 }
  0xc9   :  { %467 = vsyncpa [#allocation3 + $0x1], 1 }
  0xca   :  { %468 = vsyncpa [#allocation8], 1 }
  0xcb   :  { %470 = vsyncpa [#allocation8 + $0x1], 1 }
  0xcc   :  { %471 = vsyncpa [#allocation4], 1 }
  0xcd   :  { %473 = vsyncpa [#allocation4 + $0x1], 1 }
  0xce   :  { %474 = vsyncpa [#allocation5], 1 }
  0xcf   :  { %476 = vsyncpa [#allocation5 + $0x1], 1 }

</bundles_post_ra>
